<compile_context>
chip_gen: v5e
topology: v5e:2x2
jax: 0.10.0
libtpu: 0.0.40
codegen_flags: <defaults>
</compile_context>

<pallas_src>
import functools

import jax
import jax.numpy as jnp
from jax.experimental import pallas as pl
from jax.experimental.pallas import tpu as pltpu

EPS = 1e-5  # nn.LayerNorm default


def _round_up(x, m):
    return (x + m - 1) // m * m


def _vmem_capacity():
    """Physical VMEM bytes for this generation (fallback: conservative 64 MiB)."""
    try:
        info = pltpu.get_tpu_info()
        cap = getattr(info, "vmem_capacity_bytes", None)
        if cap:
            return int(cap)
    except Exception:
        pass
    return 64 << 20


def _select_config(M, Hp, isz, wsz):
    """Pick ('resident', tm, None) or ('stream', tm, tk) to fit the VMEM budget."""
    cap = _vmem_capacity()
    budget = int(cap * 0.85)                  # leave headroom for compiler scratch
    const_bytes = 3 * 8 * Hp * 4              # (1, Hp) blocks pad to 8 sublanes
    Mp8 = _round_up(max(M, 1), 8)
    tm_candidates = [1024, 512, 256, 128, 64, 32, 16, 8]

    # Path A: W fully resident in VMEM (single HBM read of the weights).
    w_bytes = Hp * Hp * wsz
    if w_bytes + const_bytes <= budget:
        for tm in tm_candidates:
            tm_eff = min(tm, Mp8)
            if tm_eff < 64 and Mp8 >= 64:
                break  # resident W leaves too little room for row tiles; stream instead
            need = w_bytes + 4 * tm_eff * Hp * isz + const_bytes
            if need <= budget:
                return "resident", tm_eff, None, cap

    # Path B: stream W in (tk, Hp) slabs; big tm first (amortizes W re-streaming).
    tk_candidates = [t for t in range(Hp, 127, -128) if Hp % t == 0]
    for tm in tm_candidates:
        tm_eff = min(tm, Mp8)
        for tk in tk_candidates:
            need = (4 * tm_eff * Hp * isz      # x row tile + output tile (2x buffered)
                    + 2 * tk * Hp * wsz        # weight slab (double-buffered)
                    + tm_eff * Hp * 4          # f32 accumulator scratch
                    + const_bytes)
            if need <= budget:
                return "stream", tm_eff, tk, cap

    # Last resort: smallest tiles (practically unreachable).
    return "stream", min(8, Mp8), 128, cap


def _layernorm_rows(r, g, be, h_valid):
    """Row-wise LayerNorm on (tm, Hp) f32, exact when columns >= h_valid are zero."""
    hp = r.shape[-1]
    inv_h = jnp.float32(1.0 / h_valid)
    if hp == h_valid:
        mean = jnp.sum(r, axis=-1, keepdims=True) * inv_h
        centered = r - mean
    else:
        # Padded columns of r are exactly zero by construction (x, W, b zero-
        # padded), so the sum is already correct; mask before the variance.
        lane = jax.lax.broadcasted_iota(jnp.int32, r.shape, 1)
        mask = lane < h_valid
        mean = jnp.sum(r, axis=-1, keepdims=True) * inv_h
        centered = jnp.where(mask, r - mean, 0.0)
    var = jnp.sum(centered * centered, axis=-1, keepdims=True) * inv_h
    y = centered * jax.lax.rsqrt(var + EPS)
    return y * g + be


def _addnorm_resident_kernel(x_ref, w_ref, b_ref, g_ref, be_ref, o_ref,
                             *, h_valid, cast_bf16):
    # x_ref: (tm, Hp) row tile   w_ref: (Hp, Hp) resident weight
    # b/g/be: (1, Hp)            o_ref: (tm, Hp)
    x = x_ref[...]
    lhs, rhs = x, w_ref[...]
    if cast_bf16:
        lhs = lhs.astype(jnp.bfloat16)
        rhs = rhs.astype(jnp.bfloat16)
    # r = x + (x @ W + b)   (dropout p=0 is identity)
    # TODO(synk): add stochastic dropout via pltpu.prng_* if p > 0 is needed.
    r = (x.astype(jnp.float32) + b_ref[...].astype(jnp.float32)
         + jnp.dot(lhs, rhs, preferred_element_type=jnp.float32))
    y = _layernorm_rows(r, g_ref[...].astype(jnp.float32),
                        be_ref[...].astype(jnp.float32), h_valid)
    o_ref[...] = y.astype(o_ref.dtype)


def _addnorm_stream_kernel(x_ref, w_ref, b_ref, g_ref, be_ref, o_ref, acc_ref,
                           *, h_valid, tk, cast_bf16):
    # x_ref: (tm, Hp) resident row tile (also sliced for the MXU lhs)
    # w_ref: (tk, Hp) weight K slab     acc_ref: (tm, Hp) f32 scratch (resident over K)
    k = pl.program_id(1)

    @pl.when(k == 0)
    def _():
        # Fold the residual and the linear bias into the accumulator init so
        # the serialized last-K epilogue does less VPU work.
        acc_ref[...] = x_ref[...].astype(jnp.float32) + b_ref[...].astype(jnp.float32)

    start = pl.multiple_of(k * tk, 128)          # lane-aligned slice of the row tile
    lhs = x_ref[:, pl.ds(start, tk)]
    rhs = w_ref[...]
    if cast_bf16:
        lhs = lhs.astype(jnp.bfloat16)
        rhs = rhs.astype(jnp.bfloat16)
    acc_ref[...] += jnp.dot(lhs, rhs, preferred_element_type=jnp.float32)

    @pl.when(k == pl.num_programs(1) - 1)
    def _():
        y = _layernorm_rows(acc_ref[...], g_ref[...].astype(jnp.float32),
                            be_ref[...].astype(jnp.float32), h_valid)
        o_ref[...] = y.astype(o_ref.dtype)


def _pad_params(w, b, gamma, beta, Hp):
    """Pad parameters to Hp. In production hoist this to parameter setup so the
    H^2 weight copy is not materialized on every call."""
    H = w.shape[0]
    if Hp != H:
        w = jnp.pad(w, ((0, Hp - H), (0, Hp - H)))
        b = jnp.pad(b, (0, Hp - H))
        gamma = jnp.pad(gamma, (0, Hp - H))
        beta = jnp.pad(beta, (0, Hp - H))
    return w, b.reshape(1, Hp), gamma.reshape(1, Hp), beta.reshape(1, Hp)


def add_norm(x, w, b, gamma, beta, *, cast_bf16=False):
    """out = LayerNorm(x + (x @ w + b)).

    x: (batch, seq, H);  w: (H, H) laid out (in, out);  b/gamma/beta: (H,).
    cast_bf16=True casts the matmul operands to bf16 (full-rate MXU on v6e/v7x);
    accumulation and LayerNorm stay f32.
    """
    batch, seq, H = x.shape
    M = batch * seq
    Hp = _round_up(H, 128)

    w_p, b_p, g_p, be_p = _pad_params(w, b, gamma, beta, Hp)
    isz = x.dtype.itemsize
    wsz = w_p.dtype.itemsize

    mode, tm, tk, vmem_cap = _select_config(M, Hp, isz, wsz)

    # Ensure >= 2 m-tiles whenever possible so the "parallel" M axis can shard
    # across both TensorCores on v7x (harmless on single-TC generations).
    if M > 8 and tm >= M:
        tm = _round_up((M + 1) // 2, 8)

    Mp = _round_up(max(M, 1), tm)
    num_m = Mp // tm

    # Zero-pad activations (padded rows/cols are sliced off at the end; padded
    # columns of x/W/b are zero so the LayerNorm statistics stay exact).
    x2 = x.reshape(M, H)
    if (Mp, Hp) != (M, H):
        x2 = jnp.pad(x2, ((0, Mp - M), (0, Hp - H)))

    const_bytes = 3 * 8 * Hp * 4
    if mode == "resident":
        kernel = functools.partial(_addnorm_resident_kernel,
                                   h_valid=H, cast_bf16=cast_bf16)
        grid = (num_m,)
        in_specs = [
            pl.BlockSpec((tm, Hp), lambda i: (i, 0)),                                   # x rows
            pl.BlockSpec((Hp, Hp), lambda i: (0, 0), pipeline_mode=pl.Buffered(1)),     # W resident
            pl.BlockSpec((1, Hp), lambda i: (0, 0), pipeline_mode=pl.Buffered(1)),      # bias
            pl.BlockSpec((1, Hp), lambda i: (0, 0), pipeline_mode=pl.Buffered(1)),      # gamma
            pl.BlockSpec((1, Hp), lambda i: (0, 0), pipeline_mode=pl.Buffered(1)),      # beta
        ]
        out_specs = pl.BlockSpec((tm, Hp), lambda i: (i, 0))
        scratch_shapes = []
        dims = ("parallel",)
        vmem_bytes = Hp * Hp * wsz + 4 * tm * Hp * isz + const_bytes
        w_reads = 1
    else:
        num_k = Hp // tk
        kernel = functools.partial(_addnorm_stream_kernel,
                                   h_valid=H, tk=tk, cast_bf16=cast_bf16)
        grid = (num_m, num_k)
        in_specs = [
            pl.BlockSpec((tm, Hp), lambda i, k: (i, 0)),                                # x rows
            pl.BlockSpec((tk, Hp), lambda i, k: (k, 0)),                                # W K slab
            pl.BlockSpec((1, Hp), lambda i, k: (0, 0), pipeline_mode=pl.Buffered(1)),   # bias
            pl.BlockSpec((1, Hp), lambda i, k: (0, 0), pipeline_mode=pl.Buffered(1)),   # gamma
            pl.BlockSpec((1, Hp), lambda i, k: (0, 0), pipeline_mode=pl.Buffered(1)),   # beta
        ]
        out_specs = pl.BlockSpec((tm, Hp), lambda i, k: (i, 0))
        scratch_shapes = [pltpu.VMEM((tm, Hp), jnp.float32)]
        dims = ("parallel", "arbitrary")
        vmem_bytes = (4 * tm * Hp * isz + 2 * tk * Hp * wsz
                      + tm * Hp * 4 + const_bytes)
        w_reads = num_m

    vmem_limit = min(int(vmem_cap), max(int(vmem_bytes) + (4 << 20), 16 << 20))

    cost = pl.CostEstimate(
        flops=2 * Mp * Hp * Hp + 8 * Mp * Hp,
        transcendentals=Mp,
        bytes_accessed=(2 * Mp * Hp * isz            # x read + out write
                        + w_reads * Hp * Hp * wsz    # weight traffic
                        + 3 * Hp * 4),
    )

    out = pl.pallas_call(
        kernel,
        out_shape=jax.ShapeDtypeStruct((Mp, Hp), x.dtype),
        grid_spec=pltpu.PrefetchScalarGridSpec(
            num_scalar_prefetch=0,
            grid=grid,
            in_specs=in_specs,
            out_specs=out_specs,
            scratch_shapes=scratch_shapes,
        ),
        compiler_params=pltpu.CompilerParams(
            dimension_semantics=dims,
            vmem_limit_bytes=vmem_limit,
        ),
        cost_estimate=cost,
    )(x2, w_p, b_p, g_p, be_p)

    return out[:M, :H].reshape(batch, seq, H)


def add_norm_ref(x, w, b, gamma, beta):
    """Pure-JAX reference of LayerNorm(x + Linear(x))."""
    s = jnp.einsum("bsh,hk->bsk", x.astype(jnp.float32), w.astype(jnp.float32)) + b
    r = x.astype(jnp.float32) + s
    mean = jnp.mean(r, axis=-1, keepdims=True)
    var = jnp.mean((r - mean) ** 2, axis=-1, keepdims=True)
    return ((r - mean) * jax.lax.rsqrt(var + EPS) * gamma + beta).astype(x.dtype)


if __name__ == "__main__":
    key = jax.random.PRNGKey(0)
    batch, seq, hidden = 2, 8, 32

    kx, kw, kb = jax.random.split(key, 3)
    x = jax.random.normal(kx, (batch, seq, hidden), dtype=jnp.float32)

    # Deterministic parameter init (PyTorch Linear default: U(-1/sqrt(H), 1/sqrt(H)))
    bound = 1.0 / (hidden ** 0.5)
    w = jax.random.uniform(kw, (hidden, hidden), minval=-bound, maxval=bound,
                           dtype=jnp.float32)  # (in, out) layout
    b = jax.random.uniform(kb, (hidden,), minval=-bound, maxval=bound,
                           dtype=jnp.float32)
    gamma = jnp.ones((hidden,), dtype=jnp.float32)   # nn.LayerNorm weight init
    beta = jnp.zeros((hidden,), dtype=jnp.float32)   # nn.LayerNorm bias init

    out = add_norm(x, w, b, gamma, beta)
    jax.block_until_ready(out)

    ref = add_norm_ref(x, w, b, gamma, beta)
    assert out.shape == ref.shape, "shape mismatch vs reference"
    assert jnp.allclose(out, ref, atol=1e-5, rtol=1e-5), "mismatch vs reference"

    print("KERNEL_OK")
</pallas_src>

<mosaic_0001>
module attributes {stable_mosaic.version = 11 : i64} {
  func.func @_addnorm_resident_kernel(%arg0: i32, %arg1: memref<8x128xf32, #tpu.memory_space<vmem>>, %arg2: memref<128x128xf32, #tpu.memory_space<vmem>>, %arg3: memref<1x128xf32, #tpu.memory_space<vmem>>, %arg4: memref<1x128xf32, #tpu.memory_space<vmem>>, %arg5: memref<1x128xf32, #tpu.memory_space<vmem>>, %arg6: memref<8x128xf32, #tpu.memory_space<vmem>>) attributes {dimension_semantics = [#tpu.dimension_semantics<parallel>], iteration_bounds = array<i64: 2>, scalar_prefetch = 0 : i64, scratch_operands = 0 : i64, tpu.core_type = #tpu.core_type<tc>, window_params = [{transform_indices = @transform_0, window_bounds = array<i64: 8, 128>}, {pipeline_mode = #tpu.pipeline_mode<synchronous>, transform_indices = @transform_1, window_bounds = array<i64: 128, 128>}, {pipeline_mode = #tpu.pipeline_mode<synchronous>, transform_indices = @transform_2, window_bounds = array<i64: 1, 128>}, {pipeline_mode = #tpu.pipeline_mode<synchronous>, transform_indices = @transform_3, window_bounds = array<i64: 1, 128>}, {pipeline_mode = #tpu.pipeline_mode<synchronous>, transform_indices = @transform_4, window_bounds = array<i64: 1, 128>}, {transform_indices = @transform_5, window_bounds = array<i64: 8, 128>}]} {
    %c0 = arith.constant 0 : index
    %c0_0 = arith.constant 0 : index
    %0 = vector.load %arg1[%c0, %c0_0] : memref<8x128xf32, #tpu.memory_space<vmem>>, vector<8x128xf32>
    %c0_1 = arith.constant 0 : index
    %c0_2 = arith.constant 0 : index
    %1 = vector.load %arg2[%c0_1, %c0_2] : memref<128x128xf32, #tpu.memory_space<vmem>>, vector<128x128xf32>
    %c0_3 = arith.constant 0 : index
    %c0_4 = arith.constant 0 : index
    %2 = vector.load %arg3[%c0_3, %c0_4] : memref<1x128xf32, #tpu.memory_space<vmem>>, vector<1x128xf32>
    %3 = vector.broadcast %2 : vector<1x128xf32> to vector<8x128xf32>
    %4 = arith.addf %0, %3 : vector<8x128xf32>
    %cst = arith.constant dense<0.000000e+00> : vector<8x128xf32>
    %5 = tpu.matmul %0, %1, %cst {dimension_numbers = #tpu.dot_dimension_numbers<[1], [0], [0], [1], [0, 0, 1, 1], [], []>} : vector<8x128xf32>, vector<128x128xf32>, vector<8x128xf32> -> vector<8x128xf32>
    %6 = arith.addf %4, %5 : vector<8x128xf32>
    %c0_5 = arith.constant 0 : index
    %c0_6 = arith.constant 0 : index
    %7 = vector.load %arg4[%c0_5, %c0_6] : memref<1x128xf32, #tpu.memory_space<vmem>>, vector<1x128xf32>
    %c0_7 = arith.constant 0 : index
    %c0_8 = arith.constant 0 : index
    %8 = vector.load %arg5[%c0_7, %c0_8] : memref<1x128xf32, #tpu.memory_space<vmem>>, vector<1x128xf32>
    %9 = tpu.iota {dimensions = array<i32: 1>} : vector<8x128xi32>
    %c32_i32 = arith.constant 32 : i32
    %10 = vector.broadcast %c32_i32 : i32 to vector<8x128xi32>
    %11 = arith.cmpi slt, %9, %10 : vector<8x128xi32>
    %cst_9 = arith.constant dense<0.000000e+00> : vector<8xf32>
    %12 = vector.multi_reduction <add>, %6, %cst_9 [1] : vector<8x128xf32> to vector<8xf32>
    %13 = vector.shape_cast %12 : vector<8xf32> to vector<8x1xf32>
    %cst_10 = arith.constant 3.125000e-02 : f32
    %14 = vector.broadcast %cst_10 : f32 to vector<8x1xf32>
    %15 = arith.mulf %13, %14 : vector<8x1xf32>
    %16 = vector.broadcast %15 : vector<8x1xf32> to vector<8x128xf32>
    %17 = arith.subf %6, %16 : vector<8x128xf32>
    %cst_11 = arith.constant 0.000000e+00 : f32
    %18 = vector.broadcast %cst_11 : f32 to vector<8x128xf32>
    %19 = arith.select %11, %17, %18 : vector<8x128xi1>, vector<8x128xf32>
    %20 = arith.mulf %19, %19 : vector<8x128xf32>
    %cst_12 = arith.constant dense<0.000000e+00> : vector<8xf32>
    %21 = vector.multi_reduction <add>, %20, %cst_12 [1] : vector<8x128xf32> to vector<8xf32>
    %22 = vector.shape_cast %21 : vector<8xf32> to vector<8x1xf32>
    %cst_13 = arith.constant 3.125000e-02 : f32
    %23 = vector.broadcast %cst_13 : f32 to vector<8x1xf32>
    %24 = arith.mulf %22, %23 : vector<8x1xf32>
    %cst_14 = arith.constant 9.99999974E-6 : f32
    %25 = vector.broadcast %cst_14 : f32 to vector<8x1xf32>
    %26 = arith.addf %24, %25 : vector<8x1xf32>
    %27 = math.rsqrt %26 : vector<8x1xf32>
    %28 = vector.broadcast %27 : vector<8x1xf32> to vector<8x128xf32>
    %29 = arith.mulf %19, %28 : vector<8x128xf32>
    %30 = vector.broadcast %7 : vector<1x128xf32> to vector<8x128xf32>
    %31 = arith.mulf %29, %30 : vector<8x128xf32>
    %32 = vector.broadcast %8 : vector<1x128xf32> to vector<8x128xf32>
    %33 = arith.addf %31, %32 : vector<8x128xf32>
    %c0_15 = arith.constant 0 : index
    %c0_16 = arith.constant 0 : index
    %34 = vector.load %arg6[%c0_15, %c0_16] : memref<8x128xf32, #tpu.memory_space<vmem>>, vector<8x128xf32>
    tpu.vector_store %arg6[%c0_15, %c0_16], %33 {strides = array<i32>} : memref<8x128xf32, #tpu.memory_space<vmem>>, vector<8x128xf32>,
    return
  }
  func.func @transform_0(%arg0: i32) -> (i32, i32) {
    %c0_i32 = arith.constant 0 : i32
    %c0_i32_0 = arith.constant 0 : i32
    return %arg0, %c0_i32 : i32, i32
  }
  func.func @transform_1(%arg0: i32) -> (i32, i32) {
    %c0_i32 = arith.constant 0 : i32
    %c0_i32_0 = arith.constant 0 : i32
    %c0_i32_1 = arith.constant 0 : i32
    return %c0_i32, %c0_i32_0 : i32, i32
  }
  func.func @transform_2(%arg0: i32) -> (i32, i32) {
    %c0_i32 = arith.constant 0 : i32
    %c0_i32_0 = arith.constant 0 : i32
    %c0_i32_1 = arith.constant 0 : i32
    return %c0_i32, %c0_i32_0 : i32, i32
  }
  func.func @transform_3(%arg0: i32) -> (i32, i32) {
    %c0_i32 = arith.constant 0 : i32
    %c0_i32_0 = arith.constant 0 : i32
    %c0_i32_1 = arith.constant 0 : i32
    return %c0_i32, %c0_i32_0 : i32, i32
  }
  func.func @transform_4(%arg0: i32) -> (i32, i32) {
    %c0_i32 = arith.constant 0 : i32
    %c0_i32_0 = arith.constant 0 : i32
    %c0_i32_1 = arith.constant 0 : i32
    return %c0_i32, %c0_i32_0 : i32, i32
  }
  func.func @transform_5(%arg0: i32) -> (i32, i32) {
    %c0_i32 = arith.constant 0 : i32
    %c0_i32_0 = arith.constant 0 : i32
    return %arg0, %c0_i32 : i32, i32
  }
}

</mosaic_0001>

<bundles_post_ra>
// kernel: tpu_custom_call.1
= control target key start
LH: loop header
LB: loop body
LE: loop exit
PB: predicated region body
PF: predicated region fallthrough
CT: control target
= control target key end

     0   :  { %10 = vsyncpa [#allocation3], 0  ;;  %s828_s0 = inlined_call_operand.hbm [shape: f32[16,128], index: 0, kind: input, shape index: {}]   ;;  %s829_s1 = inlined_call_operand.hbm [shape: f32[128,128], index: 1, kind: input, shape index: {}]   ;;  %s830_s2 = inlined_call_operand.vmem [shape: f32[1,128], index: 2, kind: input, shape index: {}]   ;;  %s831_s3 = inlined_call_operand.vmem [shape: f32[1,128], index: 3, kind: input, shape index: {}]   ;;  %s832_s4 = inlined_call_operand.vmem [shape: f32[1,128], index: 4, kind: input, shape index: {}]   ;;  %s833_s5 = inlined_call_operand.hbm [shape: f32[16,128], index: 5, kind: output, shape index: {}]  }
   0x1   :  { %12 = vsyncpa [#allocation3 + $0x1], 0 }
   0x2   :  { %13 = vsyncpa [#allocation6], 0 }
   0x3   :  { %14 = vsyncpa [#allocation4], 0 }
   0x4   :  { %16 = vsyncpa [#allocation4 + $0x1], 0  ;;  %s676_s18 = smov 0   ;;  %s678_s19 = smov 0  }
   0x5   :  { %s680_s20 = smov 0   ;;  %s682_s21 = smov 0  }
   0x6 LB: > { %s174_s24 = sshll.u32 %s829_s1, 4  ;;  %s700_s25 = sadd.s32 4294967295, %s641_s21   ;;  %s641_s21 = sphi %s682_s21, %s843_s21   ;;  %s637_s20 = sphi %s680_s20, %s842_s20   ;;  %s633_s19 = sphi %s678_s19, %s841_s19   ;;  %s629_s18 = sphi %s676_s18, %s840_s18   ;;  %s175_s24 = int_to_ptr.hbm [resolvable:$true] %s174_s24 }
   0x7   : > { %p434_p0 = scmp.ge.s32.totalorder %s641_s21, 1  ;;  %p43_p1 = scmp.eq.s32.totalorder %s700_s25, 0 }
   0x8   : > { %p163_p2 = scmp.lt.s32.totalorder %s641_s21, 3  ;;  %s643_s27 = smov [#allocation5]  }
   0x9   : > { %s176_s28 = sshll.u32 %s643_s27, 4  ;;  %s644_s29 = smov 128   ;;  %s177_s28 = int_to_ptr.vmem [resolvable:$true] %s176_s28 }
   0xa   : > { %p705_p3 = pnand %p434_p0, %p163_p2  ;;  %s645_s30 = smov 8  }
   0xb   : > { %s433_s6 = sadd.s32 4294967294, %s641_s21   ;;  %s716_s7 = sadd.s32 1, %s641_s21  }
   0xc   : > { %p455_p4 = pneg %p705_p3  ;;  %s29_s8 = sadd.s32 1, %s637_s20 }
   0xd   : > { %s26_s9 = ssub.s32 %s641_s21, %s716_s7  ;;  %p36_p7 = scmp.ne.s32.totalorder %s637_s20, %s633_s19 }
   0xe   : > { %p456_p6 = pnand %p455_p4, %p43_p1  ;;  %p27_p8 = scmp.eq.s32.totalorder %s26_s9, 0 }
   0xf   : > { %p37_p9 = scmp.eq.s32.totalorder %s641_s21, 0  ;;  %p42_p10 = scmp.ne.s32.totalorder %s633_s19, %s629_s18 }
  0x10   : > { %458 = dma.hbm_to_vmem [thread:$0]  (!%p456_p6), %s175_s24, 2048, %s177_s28, [#allocation6], %s644_s29, %s644_s29, %s645_s30  }
  0x11   : > { %p150_p11 = scmp.eq.s32.totalorder %s700_s25, 1  ;;  %p732_p12 = por %p43_p1, %p42_p10 }
  0x12   : > { %s728_s10 = scalar_select %p27_p8, %s637_s20, %s29_s8  }
  0x13   : > { %p736_p13 = por %p150_p11, %p36_p7  ;;  %p156_p0 = scmp.eq.s32.totalorder %s433_s6, 1 }
  0x14   : > { %p38_p2 = por %p37_p9, %p36_p7  ;;  %s199_s13 = sand.u32 1, %s637_s20  }
  0x15   : > { %p741_p4 = por %p156_p0, %p42_p10  ;;  %p468_p6 = scmp.lt.s32.totalorder %s641_s21, 2 }
  0x16   : > { %s437_s15 = sshll.u32 %s199_s13, 3  ;;  %s438_s16 = sshll.u32 %s641_s21, 3 }
  0x17   : > { %s207_s23 = scalar_lea.hbm %s828_s0, %s438_s16  ;;  %s203_s27 = scalar_lea.vmem [#allocation2], %s437_s15 }
  0x18   : > { %s209_s24 = sshll.u32 %s207_s23, 4  ;;  %s211_s28 = sshll.u32 %s203_s27, 4  ;;  %s210_s24 = int_to_ptr.hbm [resolvable:$true] %s209_s24  ;;  %s212_s28 = int_to_ptr.vmem [resolvable:$true] %s211_s28 }
  0x19   : > { %p750_p8 = pnand %p468_p6, %p38_p2  ;;  %s200_s30 = scalar_lea.sflag [#allocation3], %s199_s13 }
  0x1a   : > { %s541_s6 = sshra.s32 %s210_s24, 4  ;;  %s548_s15 = scalar_lea.hbm %s828_s0, 16  ;;  %s542_s6 = int_to_ptr.hbm [resolvable:$true] %s541_s6 }
  0x1b   : > { %s543_s8 = scalar_lea.hbm %s542_s6, 8  ;;  %p545_p9 = pneg %p750_p8 }
  0x1c   : > { %p544_p7 = scmp.ne.s32.totalorder %s542_s6, %s543_s8  ;;  %p549_p0 = scmp.lt.s32.totalorder %s542_s6, %s828_s0 }
  0x1d   : > { %p550_p2 = scmp.lt.s32.totalorder %s548_s15, %s543_s8 }
  0x1e   : > { %p546_p10 = pnand %p545_p9, %p544_p7 }
  0x1f   : > { %p551_p6 = por %p550_p2, %p549_p0 }
  0x20   : > { %p547_p11 = pneg %p546_p10 }
  0x22   : > { %p552_p5 = pnand %p551_p6, %p547_p11 }
  0x24   : > { %555 = shalt.err (!%p552_p5)
}
  0x25   : > { %462 = dma.hbm_to_vmem [thread:$0]  (!%p750_p8), %s210_s24, 128, %s212_s28, %s200_s30  }
  0x26   : > { %220 = sbr.rel (%p705_p3) target bundleno = 476 (0x1dc), region = 40  ;;  %s767_s13 = sand.u32 (!%p705_p3), 1, %s633_s19  }
  0x27   : > { %s440_s23 = sshll.u32 (!%p705_p3), %s767_s13, 3  ;;  %s223_s27 = scalar_lea.sflag (!%p705_p3), [#allocation3], %s767_s13 }
  0x28   : > { %s773_s6 = scalar_lea.vmem (!%p705_p3), [#allocation2], %s440_s23 }
  0x2b   : > { %616 = dma.done.wait (%p732_p12), %s223_s27, 128  }
  0x2c   : > { %618 = vsyncadd (%p732_p12), %s223_s27, 4294967168 }
  0x2d   : > { %620 = dma.done.wait (%p43_p1), [#allocation6], 2048  }
  0x2e   : > { %622 = vsyncadd (%p43_p1), [#allocation6], 4294965248  ;;  %v275_v0 = vld [vmem:[#allocation5 + $0x78] sm:$0xff]  ;;  %v274_v1 = vld [vmem:[#allocation5 + $0x70] sm:$0xff]  ;;  %v304_v21 = vlaneseq  ;;  %s444_s24 = sshll.u32 %s700_s25, 3  ;;  %s258_s25 = scalar_lea.vmem [#allocation7], %s440_s23 }
  0x2f   : > { %281 = vmatpush.msra.mxu0 %v275_v0  ;;  %v273_v2 = vld [vmem:[#allocation5 + $0x68] sm:$0xff]  ;;  %v272_v3 = vld [vmem:[#allocation5 + $0x60] sm:$0xff]  ;;  %v271_v4 = vld [vmem:[#allocation5 + $0x58] sm:$0xff]  ;;  %s348_s9 = scalar_lea.hbm %s833_s5, %s444_s24  ;;  %s350_s17 = sshll.u32 %s258_s25, 4  ;;  %s351_s17 = int_to_ptr.vmem [resolvable:$true] %s350_s17 }
  0x30   : > { %v270_v5 = vld [vmem:[#allocation5 + $0x50] sm:$0xff]  ;;  %v269_v6 = vld [vmem:[#allocation5 + $0x48] sm:$0xff]  ;;  %v268_v7 = vld [vmem:[#allocation5 + $0x40] sm:$0xff]  ;;  %v305_v22 = vand.u32 127, %v304_v21  ;;  %s352_s22 = sshll.u32 %s348_s9, 4  ;;  %s338_s27 = scalar_lea.sflag [#allocation4], %s767_s13  ;;  %s353_s22 = int_to_ptr.hbm [resolvable:$true] %s352_s22 }
  0x31   : > { %282 = vmatpush.msra.mxu0 %v274_v1  ;;  %v267_v8 = vld [vmem:[#allocation5 + $0x38] sm:$0xff]  ;;  %v266_v9 = vld [vmem:[#allocation5 + $0x30] sm:$0xff]  ;;  %v265_v10 = vld [vmem:[#allocation5 + $0x28] sm:$0xff]  ;;  %s591_s28 = scalar_lea.hbm %s833_s5, 16 }
  0x32   : > { %v264_v11 = vld [vmem:[#allocation5 + $0x20] sm:$0xff]  ;;  %v263_v12 = vld [vmem:[#allocation5 + $0x18] sm:$0xff]  ;;  %v262_v13 = vld [vmem:[#allocation5 + $0x10] sm:$0xff]  ;;  %vm306_vm0 = vcmp.lt.s32.totalorder %v305_v22, 32 }
  0x33   : > { %283 = vmatpush.msra.mxu0 %v273_v2  ;;  %v261_v14 = vld [vmem:[#allocation5 + $0x8] sm:$0xff]  ;;  %v260_v15 = vld [vmem:[#allocation5] sm:$0xff]  ;;  %v259_v16 = vld [vmem:[%s773_s6] sm:$0xff]  ;;  %s585_s6 = sshra.s32 %s353_s22, 4  ;;  %s586_s6 = int_to_ptr.hbm [resolvable:$true] %s585_s6 }
  0x34   : > { %v506_v17 = vld [vmem:[%s830_s2] ss:$0 sm:$0xff]  ;;  %s587_s26 = scalar_lea.hbm %s586_s6, 8  ;;  %p592_p12 = scmp.lt.s32.totalorder %s586_s6, %s833_s5 }
  0x35   : > { %284 = vmatpush.msra.mxu0 %v272_v3  ;;  %v280_v18 = vadd.f32 %v506_v17, %v259_v16  ;;  %v507_v37 = vld [vmem:[%s831_s3] ss:$0 sm:$0xff]  ;;  %p588_p1 = scmp.ne.s32.totalorder %s586_s6, %s587_s26  ;;  %p593_p8 = scmp.lt.s32.totalorder %s591_s28, %s587_s26 }
  0x36   : > { %v508_v40 = vld [vmem:[%s832_s4] ss:$0 sm:$0xff] }
  0x37   : > { %285 = vmatpush.msra.mxu0 %v271_v4  ;;  %p589_p3 = pnand %p588_p1, %p736_p13  ;;  %p594_p7 = por %p593_p8, %p592_p12 }
  0x39   : > { %286 = vmatpush.msra.mxu0 %v270_v5  ;;  %p590_p5 = pneg %p589_p3 }
  0x3b   : > { %287 = vmatpush.msra.mxu0 %v269_v6  ;;  %p595_p9 = pnand %p594_p7, %p590_p5 }
  0x3d   : > { %288 = vmatpush.msra.mxu0 %v268_v7 }
  0x3f   : > { %289 = vmatpush.msra.mxu0 %v267_v8 }
  0x41   : > { %290 = vmatpush.msra.mxu0 %v266_v9 }
  0x43   : > { %291 = vmatpush.msra.mxu0 %v265_v10 }
  0x45   : > { %292 = vmatpush.msra.mxu0 %v264_v11 }
  0x47   : > { %293 = vmatpush.msra.mxu0 %v263_v12 }
  0x49   : > { %294 = vmatpush.msra.mxu0 %v262_v13 }
  0x4b   : > { %295 = vmatpush.msra.mxu0 %v261_v14 }
  0x4d   : > { %296 = vmatpush.msra.mxu0 %v260_v15 }
  0x4e   : > { %297 = vmatmul.f32.vlgmr.msra.gmra.mxu0 %v259_v16 }
  0xcb   : > { %v298_v19 = vpop.f32.mrf.mxu0 }
  0xcc   : > { %v301_v20 = vadd.f32 %v298_v19, %v280_v18 }
  0xce   : > { %307 = vadd.xlane.f32.xlu0 %v301_v20 }
 0x141   : > { %v308_v23 = vpop.xlane.xlu0 %307 }
 0x142   : > { %v309_v24 = vmul.f32 0.03125, %v308_v23 }
 0x144   : > { %v310_v25 = vsub.f32 %v301_v20, %v309_v24 }
 0x146   : > { %v311_v26 = vsel %vm306_vm0, %v310_v25, 0.0 }
 0x147   : > { %v312_v27 = vmul.f32 %v311_v26, %v311_v26 }
 0x149   : > { %313 = vadd.xlane.f32.xlu0 %v312_v27 }
 0x1bc   : > { %v314_v28 = vpop.xlane.xlu0 %313 }
 0x1bd   : > { %v315_v29 = vmul.f32 0.03125, %v314_v28 }
 0x1bf   : > { %v316_v30 = vadd.f32 1e-05, %v315_v29 }
 0x1c1   : > { %509 = vrsqrt.f32 %v316_v30  ;;  %vm323_vm2 = vweird.f32 %v316_v30 }
 0x1c7   : > { %v510_v31 = vpop.eup %509 }
 0x1c8   : > { %v318_v32 = vmul.f32 %v510_v31, %v316_v30  ;;  %vm324_vm1 = vweird.f32 %v510_v31 }
 0x1c9   : > { %vm325_vm3 = vmor %vm323_vm2, %vm324_vm1 }
 0x1ca   : > { %v319_v33 = vmul.f32 %v510_v31, %v318_v32 }
 0x1cc   : > { %v320_v34 = vmul.f32 0.5, %v319_v33 }
 0x1ce   : > { %v321_v35 = vsub.f32 1.5, %v320_v34 }
 0x1d0   : > { %v322_v36 = vmul.f32 %v510_v31, %v321_v35 }
 0x1d2   : > { %v326_v38 = vsel %vm325_vm3, %v510_v31, %v322_v36 }
 0x1d3   : > { %v327_v39 = vmul.f32 %v326_v38, %v311_v26 }
 0x1d5   : > { %v331_v41 = vmul.f32 %v507_v37, %v327_v39 }
 0x1d7   : > { %v335_v42 = vadd.f32 %v508_v40, %v331_v41 }
 0x1d9   : > { %336 = vst [vmem:[%s258_s25] sm:$0xff] %v335_v42 }
 0x1da   : > { %598 = shalt.err (!%p595_p9)
}
 0x1db   : > { %453 = dma.vmem_to_hbm [thread:$0]  (%p736_p13), %s351_s17, 128, %s353_s22, %s338_s27  }
 0x1dc PF: > { %s364_s13 = sand.u32 1, %s629_s18   ;;  %p839_p10 = scmp.ge.s32.totalorder %s641_s21, 2 }
 0x1dd   : > { %s365_s30 = scalar_lea.sflag [#allocation4], %s364_s13 }
 0x1de   : > { %p464_p11 = pnand %p839_p10, %p741_p4 }
 0x1e0   : > { %p465_p0 = pneg %p464_p11 }
 0x1e2   : > { %624 = dma.done.wait (%p465_p0), %s365_s30, 128  }
 0x1e3   : > { %626 = vsyncadd (%p465_p0), %s365_s30, 4294967168  ;;  %p19_p2 = scmp.ge.s32.totalorder %s716_s7, 4   ;;  %s840_s18 = smov %s633_s19 }
 0x1e4   : > { %s841_s19 = smov %s637_s20  ;;  %s842_s20 = smov %s728_s10 }
 0x1e5   : > { %s843_s21 = smov %s716_s7  ;;  %21 = sbr.rel (!%p19_p2) target bundleno = 6 (0x6), region = 89 }
 0x1ea   :  { %371 = vsyncpa [#allocation3], 1 }
 0x1eb   :  { %373 = vsyncpa [#allocation3 + $0x1], 1 }
 0x1ec   :  { %374 = vsyncpa [#allocation6], 1 }
 0x1ed   :  { %375 = vsyncpa [#allocation4], 1 }
 0x1ee   :  { %377 = vsyncpa [#allocation4 + $0x1], 1 }

</bundles_post_ra>
